<compile_context>
chip_gen: v7x
topology: tpu7x:2x2x1
jax: 0.10.0
libtpu: 0.0.40
codegen_flags: <defaults>
</compile_context>

<pallas_src>
import functools

import jax
import jax.numpy as jnp
from jax import lax
from jax.experimental import pallas as pl
from jax.experimental.pallas import tpu as pltpu


def _round_up(x, m):
    return ((x + m - 1) // m) * m


def _pick_tile(dim, cap, mult):
    """Largest legal Pallas block size for `dim`:
       - the full extent if it fits under `cap` (always a legal block),
       - else the largest multiple-of-`mult` divisor of `dim` <= cap (no pad),
       - else `cap` itself (caller pads `dim` up to a multiple of `cap`)."""
    if dim <= cap:
        return dim
    t = cap - (cap % mult)
    while t >= mult:
        if dim % t == 0:
            return t
        t -= mult
    return cap


def _custom_linear_kernel(x_ref, w_ref, b_ref, o_ref, *scratch, p, seed, tm, tn):
    # x_ref : (tm, tk)   input tile
    # w_ref : (tn, tk)   weight tile in torch (OUT, IN) layout
    # b_ref : (1, tn)    bias tile
    # o_ref : (tm, tn)   output tile (resident across the k reduction axis)
    # scratch: () when the output dtype is f32 (accumulate into o_ref),
    #          (acc_ref,) f32 VMEM scratch otherwise.
    acc_ref = scratch[0] if scratch else o_ref

    # Read grid coordinates ONCE at the top of the body.  Do NOT call
    # pl.program_id / pl.num_programs inside pl.when bodies (cond-branch
    # jaxprs keep the raw primitive, which the interpret/CPU path can't lower).
    i = pl.program_id(0)
    j = pl.program_id(1)
    k = pl.program_id(2)
    nk = pl.num_programs(2)

    @pl.when(k == 0)
    def _init():
        acc_ref[...] = jnp.zeros_like(acc_ref)

    # NT matmul on the MXU: contract the last dim of both operands so the
    # (OUT, IN) torch weight layout is consumed directly; the transpose stays
    # inside VMEM instead of costing a full HBM pass in the wrapper.
    acc_ref[...] += lax.dot_general(
        x_ref[...], w_ref[...],
        dimension_numbers=(((1,), (1,)), ((), ())),
        preferred_element_type=jnp.float32)

    @pl.when(k == nk - 1)
    def _finalize():
        y = acc_ref[...] + b_ref[...].astype(jnp.float32)
        y = jnp.maximum(y, 0.0)  # ReLU

        if p >= 1.0:
            y = jnp.zeros_like(y)
        elif p > 0.0:
            keep_prob = 1.0 - p
            # Rounding the threshold introduces a ~2e-10 keep-prob bias: negligible.
            threshold = int(round(keep_prob * (2 ** 32 - 1)))
            threshold = max(0, min(threshold, 2 ** 32 - 1))

            # Stateless per-element PRNG keyed on the GLOBAL (row, col) index:
            # unique per element, independent of tile/pad choices, no 32-bit
            # flat-index overflow.
            rows = lax.broadcasted_iota(jnp.int32, y.shape, 0) + i * tm
            cols = lax.broadcasted_iota(jnp.int32, y.shape, 1) + j * tn
            z = (rows.astype(jnp.uint32) * jnp.uint32(0x9E3779B1)
                 ^ cols.astype(jnp.uint32) * jnp.uint32(0x85EBCA77)
                 ^ jnp.uint32(seed & 0xFFFFFFFF))
            z = z ^ (z >> 16)
            z = z * jnp.uint32(0x7FEB352D)
            z = z ^ (z >> 15)
            z = z * jnp.uint32(0x846CA68B)
            z = z ^ (z >> 16)

            keep = z < jnp.uint32(threshold)
            y = jnp.where(keep, y * jnp.float32(1.0 / keep_prob), 0.0)

        o_ref[...] = y.astype(o_ref.dtype)


def custom_linear(x, weight, bias, *, p=0.5, seed=0):
    """Linear -> ReLU -> Dropout(p) with a tiled Pallas TPU kernel."""
    B, IN = x.shape
    OUT, IN2 = weight.shape
    assert IN == IN2
    out_dtype = x.dtype

    # Tile selection: M cap 512 keeps the number of full weight re-streams
    # (ceil(B/tm)) low; K/N caps 1024 are 256-multiples (full MXU feed on
    # v6e/v7x) and cut per-grid-step overhead.  Double-buffered tiles stay
    # well under VMEM on every generation.
    tm = _pick_tile(B, 512, 8)
    tk = _pick_tile(IN, 1024, 128)
    tn = _pick_tile(OUT, 1024, 128)

    Bp, INp, OUTp = _round_up(B, tm), _round_up(IN, tk), _round_up(OUT, tn)

    # Padding only triggers when a dim has no legal divisor tile (rare); in
    # the common case x and weight reach the kernel untouched.
    x_p = x if (Bp, INp) == (B, IN) else jnp.pad(x, ((0, Bp - B), (0, INp - IN)))
    w_p = (weight if (OUTp, INp) == (OUT, IN)
           else jnp.pad(weight, ((0, OUTp - OUT), (0, INp - IN))))
    b2 = bias.reshape(1, OUT)
    b_p = b2 if OUTp == OUT else jnp.pad(b2, ((0, 0), (0, OUTp - OUT)))

    grid = (Bp // tm, OUTp // tn, INp // tk)

    # f32 output: accumulate directly into the resident output block.
    use_scratch = jnp.dtype(out_dtype) != jnp.dtype(jnp.float32)
    scratch_shapes = [pltpu.VMEM((tm, tn), jnp.float32)] if use_scratch else []

    kernel = functools.partial(_custom_linear_kernel,
                               p=float(p), seed=int(seed), tm=tm, tn=tn)

    in_sz = jnp.dtype(x.dtype).itemsize
    out_sz = jnp.dtype(out_dtype).itemsize
    # VMEM budget: double-buffered tiles + optional accumulator, ~1.5x slack,
    # clamped below v7x's 64 MiB physical VMEM.
    need = (2 * (tm * tk + tn * tk + tn) * in_sz
            + 2 * tm * tn * out_sz
            + (tm * tn * 4 if use_scratch else 0))
    vmem_limit = int(min(max(need * 3 // 2, 16 * 1024 * 1024), 48 * 1024 * 1024))

    cost = pl.CostEstimate(
        flops=2 * Bp * INp * OUTp,
        transcendentals=0,
        bytes_accessed=(Bp * INp + INp * OUTp + OUTp) * in_sz + Bp * OUTp * out_sz,
    )

    out_p = pl.pallas_call(
        kernel,
        out_shape=jax.ShapeDtypeStruct((Bp, OUTp), out_dtype),
        grid=grid,
        in_specs=[
            pl.BlockSpec((tm, tk), lambda i, j, k: (i, k)),   # x
            pl.BlockSpec((tn, tk), lambda i, j, k: (j, k)),   # weight (OUT, IN)
            pl.BlockSpec((1, tn), lambda i, j, k: (0, j)),    # bias
        ],
        out_specs=pl.BlockSpec((tm, tn), lambda i, j, k: (i, j)),
        scratch_shapes=scratch_shapes,
        compiler_params=pltpu.CompilerParams(
            dimension_semantics=("parallel", "parallel", "arbitrary"),
            vmem_limit_bytes=vmem_limit,
        ),
        cost_estimate=cost,
    )(x_p, w_p, b_p)

    if (Bp, OUTp) != (B, OUT):
        out_p = out_p[:B, :OUT]
    return out_p


if __name__ == "__main__":
    B, IN, OUT = 8, 32, 128
    p = 0.5

    key = jax.random.PRNGKey(0)
    kx, kw, kb = jax.random.split(key, 3)
    x = jax.random.normal(kx, (B, IN), dtype=jnp.float32)
    weight = jax.random.normal(kw, (OUT, IN), dtype=jnp.float32) * 0.1
    bias = jax.random.normal(kb, (OUT,), dtype=jnp.float32) * 0.1

    out = jax.block_until_ready(custom_linear(x, weight, bias, p=p, seed=1234))

    # Reference: Linear -> ReLU.  With inverted dropout, every surviving entry
    # equals ref / (1 - p); dropped entries are exactly zero.
    ref = jnp.maximum(x @ weight.T + bias, 0.0)
    scaled = ref / (1.0 - p)
    tol = 1e-3 + 1e-3 * jnp.abs(scaled)
    nonzero = out != 0.0

    assert out.shape == (B, OUT)
    assert bool(jnp.all(jnp.where(nonzero, jnp.abs(out - scaled) <= tol, True)))
    # With p=0.5 over 1024 elements, some positive activations must be dropped.
    assert bool(jnp.any(jnp.logical_and(ref > 0, out == 0)))

    # p = 0 path must reproduce Linear -> ReLU (dropout disabled).
    out0 = jax.block_until_ready(custom_linear(x, weight, bias, p=0.0, seed=0))
    assert bool(jnp.all(jnp.abs(out0 - ref) <= 1e-3 + 1e-3 * jnp.abs(ref)))

    print("KERNEL_OK")
</pallas_src>

<mosaic_0001>
module attributes {stable_mosaic.version = 11 : i64} {
  func.func @_custom_linear_kernel(%arg0: i32, %arg1: i32, %arg2: i32, %arg3: memref<8x32xf32, #tpu.memory_space<vmem>>, %arg4: memref<128x32xf32, #tpu.memory_space<vmem>>, %arg5: memref<1x128xf32, #tpu.memory_space<vmem>>, %arg6: memref<8x128xf32, #tpu.memory_space<vmem>>) attributes {dimension_semantics = [#tpu.dimension_semantics<parallel>, #tpu.dimension_semantics<parallel>, #tpu.dimension_semantics<arbitrary>], iteration_bounds = array<i64: 1, 1, 1>, scalar_prefetch = 0 : i64, scratch_operands = 0 : i64, tpu.core_type = #tpu.core_type<tc>, window_params = [{transform_indices = @transform_0, window_bounds = array<i64: 8, 32>}, {transform_indices = @transform_1, window_bounds = array<i64: 128, 32>}, {transform_indices = @transform_2, window_bounds = array<i64: 1, 128>}, {transform_indices = @transform_3, window_bounds = array<i64: 8, 128>}]} {
    %c0_i32 = arith.constant 0 : i32
    %0 = arith.cmpi eq, %arg2, %c0_i32 : i32
    %1 = arith.extui %0 : i1 to i32
    %c0_i32_0 = arith.constant 0 : i32
    %2 = arith.cmpi ne, %1, %c0_i32_0 : i32
    scf.if %2 {
      %cst_10 = arith.constant 0.000000e+00 : f32
      %12 = vector.broadcast %cst_10 : f32 to vector<8x128xf32>
      %c0_11 = arith.constant 0 : index
      %c0_12 = arith.constant 0 : index
      %13 = vector.load %arg6[%c0_11, %c0_12] : memref<8x128xf32, #tpu.memory_space<vmem>>, vector<8x128xf32>
      tpu.vector_store %arg6[%c0_11, %c0_12], %12 {strides = array<i32>} : memref<8x128xf32, #tpu.memory_space<vmem>>, vector<8x128xf32>,
    } else {
    }
    %c0 = arith.constant 0 : index
    %c0_1 = arith.constant 0 : index
    %3 = vector.load %arg6[%c0, %c0_1] : memref<8x128xf32, #tpu.memory_space<vmem>>, vector<8x128xf32>
    %c0_2 = arith.constant 0 : index
    %c0_3 = arith.constant 0 : index
    %4 = vector.load %arg3[%c0_2, %c0_3] : memref<8x32xf32, #tpu.memory_space<vmem>>, vector<8x32xf32>
    %c0_4 = arith.constant 0 : index
    %c0_5 = arith.constant 0 : index
    %5 = vector.load %arg4[%c0_4, %c0_5] : memref<128x32xf32, #tpu.memory_space<vmem>>, vector<128x32xf32>
    %cst = arith.constant dense<0.000000e+00> : vector<8x128xf32>
    %6 = tpu.matmul %4, %5, %cst {dimension_numbers = #tpu.dot_dimension_numbers<[1], [1], [0], [0], [0, 0, 1, 0], [], []>} : vector<8x32xf32>, vector<128x32xf32>, vector<8x128xf32> -> vector<8x128xf32>
    %7 = arith.addf %3, %6 : vector<8x128xf32>
    %c0_6 = arith.constant 0 : index
    %c0_7 = arith.constant 0 : index
    %8 = vector.load %arg6[%c0_6, %c0_7] : memref<8x128xf32, #tpu.memory_space<vmem>>, vector<8x128xf32>
    tpu.vector_store %arg6[%c0_6, %c0_7], %7 {strides = array<i32>} : memref<8x128xf32, #tpu.memory_space<vmem>>, vector<8x128xf32>,
    %c0_i32_8 = arith.constant 0 : i32
    %9 = arith.cmpi eq, %arg2, %c0_i32_8 : i32
    %10 = arith.extui %9 : i1 to i32
    %c0_i32_9 = arith.constant 0 : i32
    %11 = arith.cmpi ne, %10, %c0_i32_9 : i32
    scf.if %11 {
      %c0_10 = arith.constant 0 : index
      %c0_11 = arith.constant 0 : index
      %12 = vector.load %arg6[%c0_10, %c0_11] : memref<8x128xf32, #tpu.memory_space<vmem>>, vector<8x128xf32>
      %c0_12 = arith.constant 0 : index
      %c0_13 = arith.constant 0 : index
      %13 = vector.load %arg5[%c0_12, %c0_13] : memref<1x128xf32, #tpu.memory_space<vmem>>, vector<1x128xf32>
      %14 = vector.broadcast %13 : vector<1x128xf32> to vector<8x128xf32>
      %15 = arith.addf %12, %14 : vector<8x128xf32>
      %cst_14 = arith.constant 0.000000e+00 : f32
      %16 = vector.broadcast %cst_14 : f32 to vector<8x128xf32>
      %17 = arith.maximumf %15, %16 : vector<8x128xf32>
      %18 = tpu.iota {dimensions = array<i32: 0>} : vector<8x128xi32>
      %c8_i32 = arith.constant 8 : i32
      %19 = arith.muli %arg0, %c8_i32 : i32
      %20 = vector.broadcast %19 : i32 to vector<8x128xi32>
      %21 = arith.addi %18, %20 : vector<8x128xi32>
      %22 = tpu.iota {dimensions = array<i32: 1>} : vector<8x128xi32>
      %c128_i32 = arith.constant 128 : i32
      %23 = arith.muli %arg1, %c128_i32 : i32
      %24 = vector.broadcast %23 : i32 to vector<8x128xi32>
      %25 = arith.addi %22, %24 : vector<8x128xi32>
      %c-1640531535_i32 = arith.constant -1640531535 : i32
      %26 = vector.broadcast %c-1640531535_i32 : i32 to vector<8x128xi32>
      %27 = arith.muli %21, %26 : vector<8x128xi32>
      %c-2048144777_i32 = arith.constant -2048144777 : i32
      %28 = vector.broadcast %c-2048144777_i32 : i32 to vector<8x128xi32>
      %29 = arith.muli %25, %28 : vector<8x128xi32>
      %30 = arith.xori %27, %29 : vector<8x128xi32>
      %c1234_i32 = arith.constant 1234 : i32
      %31 = vector.broadcast %c1234_i32 : i32 to vector<8x128xi32>
      %32 = arith.xori %30, %31 : vector<8x128xi32>
      %c16_i32 = arith.constant 16 : i32
      %33 = vector.broadcast %c16_i32 : i32 to vector<8x128xi32>
      %34 = arith.shrui %32, %33 : vector<8x128xi32>
      %35 = arith.xori %32, %34 : vector<8x128xi32>
      %c2146121005_i32 = arith.constant 2146121005 : i32
      %36 = vector.broadcast %c2146121005_i32 : i32 to vector<8x128xi32>
      %37 = arith.muli %35, %36 : vector<8x128xi32>
      %c15_i32 = arith.constant 15 : i32
      %38 = vector.broadcast %c15_i32 : i32 to vector<8x128xi32>
      %39 = arith.shrui %37, %38 : vector<8x128xi32>
      %40 = arith.xori %37, %39 : vector<8x128xi32>
      %c-2073254261_i32 = arith.constant -2073254261 : i32
      %41 = vector.broadcast %c-2073254261_i32 : i32 to vector<8x128xi32>
      %42 = arith.muli %40, %41 : vector<8x128xi32>
      %c16_i32_15 = arith.constant 16 : i32
      %43 = vector.broadcast %c16_i32_15 : i32 to vector<8x128xi32>
      %44 = arith.shrui %42, %43 : vector<8x128xi32>
      %45 = arith.xori %42, %44 : vector<8x128xi32>
      %c-2147483648_i32 = arith.constant -2147483648 : i32
      %46 = vector.broadcast %c-2147483648_i32 : i32 to vector<8x128xi32>
      %47 = arith.cmpi ult, %45, %46 : vector<8x128xi32>
      %cst_16 = arith.constant 2.000000e+00 : f32
      %48 = vector.broadcast %cst_16 : f32 to vector<8x128xf32>
      %49 = arith.mulf %17, %48 : vector<8x128xf32>
      %cst_17 = arith.constant 0.000000e+00 : f32
      %50 = vector.broadcast %cst_17 : f32 to vector<8x128xf32>
      %51 = arith.select %47, %49, %50 : vector<8x128xi1>, vector<8x128xf32>
      %c0_18 = arith.constant 0 : index
      %c0_19 = arith.constant 0 : index
      %52 = vector.load %arg6[%c0_18, %c0_19] : memref<8x128xf32, #tpu.memory_space<vmem>>, vector<8x128xf32>
      tpu.vector_store %arg6[%c0_18, %c0_19], %51 {strides = array<i32>} : memref<8x128xf32, #tpu.memory_space<vmem>>, vector<8x128xf32>,
    } else {
    }
    return
  }
  func.func @transform_0(%arg0: i32, %arg1: i32, %arg2: i32) -> (i32, i32) {
    %c0_i32 = arith.constant 0 : i32
    return %arg0, %arg2 : i32, i32
  }
  func.func @transform_1(%arg0: i32, %arg1: i32, %arg2: i32) -> (i32, i32) {
    %c0_i32 = arith.constant 0 : i32
    return %arg1, %arg2 : i32, i32
  }
  func.func @transform_2(%arg0: i32, %arg1: i32, %arg2: i32) -> (i32, i32) {
    %c0_i32 = arith.constant 0 : i32
    %c0_i32_0 = arith.constant 0 : i32
    return %c0_i32, %arg1 : i32, i32
  }
  func.func @transform_3(%arg0: i32, %arg1: i32, %arg2: i32) -> (i32, i32) {
    %c0_i32 = arith.constant 0 : i32
    return %arg0, %arg1 : i32, i32
  }
}

</mosaic_0001>

<bundles_post_ra>
// kernel: tpu_custom_call.1
= control target key start
LH: loop header
LB: loop body
LE: loop exit
PB: predicated region body
PF: predicated region fallthrough
CT: control target
= control target key end

     0   :  { %vm38_vm0 = vcmask 261120   ;;  %v345_v2 = vmov 0.0|0.0   ;;  %vm346_vm2 = vmmov 0   ;;  %v347_v5 = vmov 0.0   ;;  %s458_s0 = inlined_call_operand.vmem [shape: f32[8,32], index: 0, kind: input, shape index: {}]   ;;  %s459_s1 = inlined_call_operand.vmem [shape: f32[128,32], index: 1, kind: input, shape index: {}]   ;;  %s460_s2 = inlined_call_operand.vmem [shape: f32[1,128], index: 2, kind: input, shape index: {}]   ;;  %s461_s3 = inlined_call_operand.hbm [shape: f32[8,128], index: 3, kind: output, shape index: {}]  }
   0x1   :  { %v22_v0 = vld [vmem:[%s459_s1] sm:$0xff]  ;;  %v23_v1 = vld [vmem:[%s459_s1 + $0x8] sm:$0xff]  ;;  %285 = vmatprep.subr.bf16.mxu0 %v345_v2  ;;  %vm377_vm1 = vmpackc.low %vm38_vm0, %vm38_vm0  ;;  %282 = vmatprep.mubr.msk.f32.mxu0 %vm346_vm2, %v347_v5 }
   0x2   :  { %v286_v3 = vpack.c.bf16 %v23_v1, %v22_v0  ;;  %v24_v6 = vld [vmem:[%s459_s1 + $0x10] sm:$0xff]  ;;  %v25_v7 = vld [vmem:[%s459_s1 + $0x18] sm:$0xff] }
   0x4   :  { %288 = vmatpush3.bf16.xpose.msk.msra.mxu0 %vm377_vm1, %v286_v3 }
   0x5   :  { %289 = vmatprep.subr.bf16.mxu0 %v345_v2 }
   0x6   :  { %8 = vsyncpa [#allocation3], 0  ;;  %v290_v8 = vpack.c.bf16 %v25_v7, %v24_v6  ;;  %v26_v9 = vld [vmem:[%s459_s1 + $0x20] sm:$0xff]  ;;  %v27_v10 = vld [vmem:[%s459_s1 + $0x28] sm:$0xff]  ;;  %v175_v28 = vlaneseq }
   0x7   :  { %v294_v11 = vpack.c.bf16 %v27_v10, %v26_v9  ;;  %v28_v12 = vld [vmem:[%s459_s1 + $0x30] sm:$0xff]  ;;  %v29_v13 = vld [vmem:[%s459_s1 + $0x38] sm:$0xff]  ;;  %v30_v15 = vld [vmem:[%s459_s1 + $0x40] sm:$0xff] }
   0x8   :  { %v298_v14 = vpack.c.bf16 %v29_v13, %v28_v12  ;;  %v31_v16 = vld [vmem:[%s459_s1 + $0x48] sm:$0xff]  ;;  %v32_v18 = vld [vmem:[%s459_s1 + $0x50] sm:$0xff]  ;;  %v33_v19 = vld [vmem:[%s459_s1 + $0x58] sm:$0xff]  ;;  %v176_v29 = vshrl.u32 %v175_v28, 7  ;;  %v181_v30 = vand.u32 127, %v175_v28 }
   0x9   :  { %v302_v17 = vpack.c.bf16 %v31_v16, %v30_v15  ;;  %v306_v20 = vpack.c.bf16 %v33_v19, %v32_v18  ;;  %v34_v21 = vld [vmem:[%s459_s1 + $0x60] sm:$0xff]  ;;  %v35_v22 = vld [vmem:[%s459_s1 + $0x68] sm:$0xff]  ;;  %v36_v24 = vld [vmem:[%s459_s1 + $0x70] sm:$0xff] }
   0xa   :  { %v310_v23 = vpack.c.bf16 %v35_v22, %v34_v21  ;;  %v37_v25 = vld [vmem:[%s459_s1 + $0x78] sm:$0xff]  ;;  %v21_v27 = vld [vmem:[%s458_s0] sm:$0xff]  ;;  %v185_v31 = vmul.u32 2654435761, %v176_v29  ;;  %v186_v32 = vmul.u32 2246822519, %v181_v30 }
   0xb   :  { %v314_v26 = vpack.c.bf16 %v37_v25, %v36_v24  ;;  %v232_v43 = vld [vmem:[%s460_s2] ss:$0 sm:$0xff]  ;;  %s348_s0 = smov [#allocation2]  }
   0xc   :  { %292 = vmatpush3.bf16.xpose.msk.msra.mxu0 %vm377_vm1, %v290_v8  ;;  %v187_v33 = vxor.u32 %v186_v32, %v185_v31  ;;  %s207_s20 = sshll.u32 %s348_s0, 4  ;;  %s208_s20 = int_to_ptr.vmem [resolvable:$true] %s207_s20 }
   0xd   :  { %293 = vmatprep.subr.bf16.mxu0 %v345_v2  ;;  %s321_s21 = scalar_lea.vmem %s208_s20, 128  ;;  %p326_p1 = scmp.lt.s32.totalorder %s208_s20, %s208_s20 }
   0xe   :  { %v188_v34 = vxor.u32 1234, %v187_v33  ;;  %p322_p0 = scmp.ne.s32.totalorder %s208_s20, %s321_s21  ;;  %p327_p2 = scmp.lt.s32.totalorder %s321_s21, %s321_s21 }
  0x10   :  { %v189_v35 = vshrl.u32 %v188_v34, 16  ;;  %p328_p3 = por %p327_p2, %p326_p1 }
  0x12   :  { %v190_v36 = vxor.u32 %v189_v35, %v188_v34  ;;  %p329_p4 = pnand %p328_p3, %p322_p0 }
  0x14   :  { %296 = vmatpush3.bf16.xpose.msk.msra.mxu0 %vm377_vm1, %v294_v11  ;;  %v191_v37 = vmul.u32 2146121005, %v190_v36 }
  0x15   :  { %297 = vmatprep.subr.bf16.mxu0 %v345_v2 }
  0x16   :  { %v192_v38 = vshrl.u32 %v191_v37, 15 }
  0x18   :  { %v193_v39 = vxor.u32 %v192_v38, %v191_v37 }
  0x1a   :  { %v194_v40 = vmul.u32 2221713035, %v193_v39 }
  0x1c   :  { %300 = vmatpush3.bf16.xpose.msk.msra.mxu0 %vm377_vm1, %v298_v14  ;;  %v195_v41 = vshrl.u32 %v194_v40, 16 }
  0x1d   :  { %301 = vmatprep.subr.bf16.mxu0 %v345_v2 }
  0x1e   :  { %v196_v45 = vxor.u32 %v195_v41, %v194_v40 }
  0x20   :  { %vm197_vm3 = vcmp.lt.u32.totalorder %v196_v45, 2147483648 }
  0x24   :  { %304 = vmatpush3.bf16.xpose.msk.msra.mxu0 %vm377_vm1, %v302_v17 }
  0x25   :  { %305 = vmatprep.subr.bf16.mxu0 %v345_v2 }
  0x2c   :  { %308 = vmatpush3.bf16.xpose.msk.msra.mxu0 %vm377_vm1, %v306_v20 }
  0x2d   :  { %309 = vmatprep.subr.bf16.mxu0 %v345_v2 }
  0x34   :  { %312 = vmatpush3.bf16.xpose.msk.msra.mxu0 %vm377_vm1, %v310_v23 }
  0x35   :  { %313 = vmatprep.subr.bf16.mxu0 %v345_v2 }
  0x3c   :  { %316 = vmatpush3.bf16.xpose.msk.msra.mxu0 %vm377_vm1, %v314_v26 }
  0x43   :  { %283 = vmatmul.mubr.msk.f32.vlgmr.msra.gmra.mrb[0].mxu0 %vm38_vm0, %v21_v27 }
 0x116   :  { %v156_v42 = vpop.f32.mrb[0].mxu0 }
 0x117   :  { %v284_v44 = vpop.f32.mrb[1].mxu0  ;;  %v173_v46 = vadd.f32 %v232_v43, %v156_v42 }
 0x119   :  { %v174_v47 = vmax.f32 %v173_v46, 0.0 }
 0x11b   :  { %v198_v48 = vmul.f32 2.0, %v174_v47 }
 0x11d   :  { %v199_v49 = vsel %vm197_vm3, %v198_v48, 0.0 }
 0x11e   :  { %200 = vst [vmem:[#allocation2] sm:$0xff] %v199_v49 }
 0x11f   :  { %332 = shalt.err (!%p329_p4)
}
 0x120   :  { %s333_s23 = scalar_lea.hbm %s461_s3, 128 }
 0x121   :  { %p334_p5 = scmp.ne.s32.totalorder %s461_s3, %s333_s23  ;;  %p337_p6 = scmp.lt.u32.totalorder %s333_s23, %s461_s3 }
 0x123   :  { %p339_p7 = pnand %p337_p6, %p334_p5 }
 0x125   :  { %342 = shalt.err (!%p339_p7)
}
 0x126   :  { %210 = dma.vmem_to_hbm [thread:$0]  %s208_s20, 128, %s461_s3, [#allocation3]  }
 0x127   :  { %343 = dma.done.wait [#allocation3], 128  }
 0x128   :  { %344 = vsyncadd [#allocation3], 4294967168 }
 0x129   :  { %214 = vsyncpa [#allocation3], 1 }

</bundles_post_ra>
